<compile_context>
chip_gen: v7x
topology: tpu7x:2x2x1
jax: 0.10.0
libtpu: 0.0.40
codegen_flags: <defaults>
</compile_context>

<pallas_src>
import functools
import math

import jax
import jax.numpy as jnp
from jax.experimental import pallas as pl
from jax.experimental.pallas import tpu as pltpu

EPS = 1e-5

# Row layout of the packed (16, D) vector slab.
_VEC_KEYS = ("bq1", "bo1", "g1", "be1", "bq2", "bo2", "g2", "be2", "b2", "g3", "be3")
(BQ1, BO1, G1, BE1, BQ2, BO2, G2, BE2, B2, G3, BE3) = range(len(_VEC_KEYS))
_VEC_ROWS = 16  # padded to a sublane multiple of 8


def pack_params(p):
    """One-time host-side packing: 20 arrays -> 5 (plus target/memory at call time)."""
    d = p["Wq1"].shape[0]
    wstack = jnp.stack([p["Wq1"], p["Wo1"], p["Wq2"], p["Wo2"]], axis=0).astype(jnp.bfloat16)
    rows = [p[k].reshape(1, d).astype(jnp.float32) for k in _VEC_KEYS]
    rows.append(jnp.zeros((_VEC_ROWS - len(_VEC_KEYS), d), jnp.float32))
    vecs = jnp.concatenate(rows, axis=0)                                    # (16, D) f32
    return {
        "wstack": wstack,                                                   # (4, D, D) bf16
        "vecs": vecs,
        "W1": p["W1"].astype(jnp.bfloat16),                                 # (D, M) bf16
        "b1": p["b1"].astype(jnp.float32),                                  # (1, M) f32
        "W2": p["W2"].astype(jnp.bfloat16),                                 # (M, D) bf16
    }


# --------------------------------------------------------------------------
# Single fused decoder-layer kernel (attn + norms + FF + residuals)
# --------------------------------------------------------------------------
def _decoder_kernel(tgt_ref, mem_ref, wstack_ref, vecs_ref, w1_ref, b1_ref, w2_ref,
                    o_ref, *, sk, scale):
    f32 = jnp.float32
    bf16 = jnp.bfloat16

    tgt = tgt_ref[...]                                                      # (B, T, D) f32
    bsz, tlen, d = tgt.shape
    inv_dm1 = 1.0 / (d - 1)

    def vec(i):                                                             # (1, D) f32, static slice
        return vecs_ref[i:i + 1, :]

    def quirk_norm_2d(x, g, b):
        # NormalizationLayer on a 2-D input: mean(dim=1) and std(dim=-1, ddof=1) are both over D.
        mean = jnp.mean(x, axis=-1, keepdims=True)
        var = jnp.sum((x - mean) ** 2, axis=-1, keepdims=True) * inv_dm1
        return g * ((x - mean) / (jnp.sqrt(var) + EPS)) + b

    # ---- self-attention (q = k = v = linear_q(target)); only batch 0 is ever consumed ----
    x0 = tgt[0]                                                             # (T, D)
    q = jnp.dot(x0.astype(bf16), wstack_ref[0], preferred_element_type=f32) + vec(BQ1)
    qb = q.astype(bf16)
    s = jax.lax.dot_general(qb, qb, (((1,), (1,)), ((), ())),
                            preferred_element_type=f32) * scale             # (T, T)
    s = s - jnp.max(s, axis=-1, keepdims=True)
    e = jnp.exp(s)
    att = e / jnp.sum(e, axis=-1, keepdims=True)
    ctx = jnp.dot(att.astype(bf16), qb, preferred_element_type=f32)         # (T, D)
    a1 = jnp.dot(ctx.astype(bf16), wstack_ref[1], preferred_element_type=f32) + vec(BO1)
    add_a = quirk_norm_2d(a1, vec(G1), vec(BE1))                            # (T, D)

    # ---- cross-attention: only query row 0 of the (T, 1, D) result is consumed ----
    # Fuse the two Wq2 matmuls: project [query-row-0 ; first Sk flattened memory rows] at once.
    qk_in = jnp.concatenate([add_a[0:1, :], mem_ref[0:sk, :]], axis=0)      # (1+Sk, D)
    proj = jnp.dot(qk_in.astype(bf16), wstack_ref[2],
                   preferred_element_type=f32) + vec(BQ2)                   # (1+Sk, D)
    qp0 = proj[0:1, :]                                                      # (1, D)
    kp = proj[1:, :]                                                        # (Sk, D)
    sc = jax.lax.dot_general(qp0, kp, (((1,), (1,)), ((), ())),
                             preferred_element_type=f32) * scale            # (1, Sk) lane-major
    sc = sc - jnp.max(sc, axis=-1, keepdims=True)
    ec = jnp.exp(sc)
    attc = ec / jnp.sum(ec, axis=-1, keepdims=True)                         # (1, Sk)
    ctx2 = jnp.dot(attc, kp, preferred_element_type=f32)                    # (1, D)
    c = jnp.dot(ctx2.astype(bf16), wstack_ref[3], preferred_element_type=f32) + vec(BO2)
    add_b = quirk_norm_2d(c, vec(G2), vec(BE2))                             # (1, D)

    # ---- residuals + FeedForward + norm3 + residual, all batches in one matmul ----
    tgt = tgt + (add_a + add_b)[None, :, :]                                 # (B, T, D)
    tgt2 = tgt.reshape(bsz * tlen, d)                                       # (B*T, D)
    h = jnp.maximum(
        jnp.dot(tgt2.astype(bf16), w1_ref[...], preferred_element_type=f32) + b1_ref[...], 0.0)
    ff = jnp.dot(h.astype(bf16), w2_ref[...], preferred_element_type=f32) + vec(B2)
    ff3 = ff.reshape(bsz, tlen, d)

    # norm3 on 3-D: mean over dim=1 (seq), unbiased std over dim=-1 (D)
    mean_t = jnp.mean(ff3, axis=1, keepdims=True)                           # (B, 1, D)
    mean_d = jnp.mean(ff3, axis=-1, keepdims=True)                          # (B, T, 1)
    var_d = jnp.sum((ff3 - mean_d) ** 2, axis=-1, keepdims=True) * inv_dm1
    normed = vec(G3) * ((ff3 - mean_t) / (jnp.sqrt(var_d) + EPS)) + vec(BE3)

    o_ref[...] = tgt + normed


def decoder_forward(target, memory, pk):
    B, T, D = target.shape
    Bm, S, _ = memory.shape
    assert (Bm * S) % T == 0, "the reference .view() requires B*S divisible by T"
    Sk = (Bm * S) // T
    M = pk["W1"].shape[1]

    # Metadata-only reshape; the BlockSpec DMAs only the first sublane-aligned chunk that
    # covers the Sk rows actually attended to (no host-side materialized slice op).
    mem2d = memory.reshape(Bm * S, D)
    sk_blk = min(-(-Sk // 8) * 8, Bm * S)

    kern = functools.partial(_decoder_kernel, sk=Sk, scale=1.0 / math.sqrt(D))
    full2 = lambda i: (0, 0)
    full3 = lambda i: (0, 0, 0)
    return pl.pallas_call(
        kern,
        out_shape=jax.ShapeDtypeStruct((B, T, D), jnp.float32),
        grid=(1,),
        in_specs=[
            pl.BlockSpec((B, T, D), full3),       # target
            pl.BlockSpec((sk_blk, D), full2),     # flattened memory, first aligned rows only
            pl.BlockSpec((4, D, D), full3),       # [Wq1, Wo1, Wq2, Wo2] bf16
            pl.BlockSpec((_VEC_ROWS, D), full2),  # packed (1,D) biases / gammas / betas f32
            pl.BlockSpec((D, M), full2),          # W1 bf16
            pl.BlockSpec((1, M), full2),          # b1 f32
            pl.BlockSpec((M, D), full2),          # W2 bf16
        ],
        out_specs=pl.BlockSpec((B, T, D), full3),
        compiler_params=pltpu.CompilerParams(
            dimension_semantics=("arbitrary",),
            # Explicit scoped-VMEM cap: headroom at real sizes (D=512, M>=1024) on v7x's
            # 64 MiB physical VMEM; a no-op at these toy sizes.
            vmem_limit_bytes=32 * 1024 * 1024,
        ),
    )(target, mem2d, pk["wstack"], pk["vecs"], pk["W1"], pk["b1"], pk["W2"])


# --------------------------------------------------------------------------
# Pure-JAX reference (mirrors the PyTorch forward exactly), for validation
# --------------------------------------------------------------------------
def decoder_reference(target, memory, p):
    hi = jax.lax.Precision.HIGHEST
    B, T, D = target.shape
    _, S, _ = memory.shape
    Sk = (B * S) // T

    def quirk_norm(x, g, be):
        mean = jnp.mean(x, axis=1, keepdims=True)
        std = jnp.std(x, axis=-1, keepdims=True, ddof=1)
        return g * ((x - mean) / (std + EPS)) + be

    # self-attention (q = k = v = linear_q(target)), full batch
    q = jnp.dot(target, p["Wq1"], precision=hi) + p["bq1"]
    s = jnp.einsum("btd,bsd->bts", q, q, precision=hi) / math.sqrt(D)
    a = jax.nn.softmax(s, axis=-1)
    ctx = jnp.einsum("bts,bsd->btd", a, q, precision=hi)
    mha1 = jnp.dot(ctx, p["Wo1"], precision=hi) + p["bo1"]                  # (B, T, D)

    t2 = mha1[0]                                                            # (T, D)
    t2 = quirk_norm(t2, p["g1"], p["be1"])
    tgt = target + t2

    # cross-attention with 2-D query
    qp = jnp.dot(t2, p["Wq2"], precision=hi) + p["bq2"]                     # (T, D)
    memf = (jnp.dot(memory, p["Wq2"], precision=hi) + p["bq2"]).reshape(B * S, D)
    kp3 = memf.reshape(T, Sk, D)
    sc = jnp.einsum("td,tjd->tj", qp, kp3, precision=hi) / math.sqrt(D)
    ac = jax.nn.softmax(sc, axis=-1)
    ctx2 = jnp.einsum("tj,tjd->td", ac, kp3, precision=hi)
    mha2 = jnp.dot(ctx2, p["Wo2"], precision=hi) + p["bo2"]                 # (T, D) == (T,1,D)

    t2 = mha2[0:1]                                                          # (1, D)
    t2 = quirk_norm(t2, p["g2"], p["be2"])
    tgt = tgt + t2

    h = jnp.maximum(jnp.dot(tgt, p["W1"], precision=hi) + p["b1"], 0.0)
    ff = jnp.dot(h, p["W2"], precision=hi) + p["b2"]
    t2 = quirk_norm(ff, p["g3"], p["be3"])
    return tgt + t2


# --------------------------------------------------------------------------
if __name__ == "__main__":
    B, T, S = 2, 8, 8            # batch, target seq, memory seq   ((B*S) % T == 0)
    D, M = 128, 256              # d_model, d_mlp (scaled-down versions of 512 / 1024)

    key = jax.random.PRNGKey(0)
    ks = jax.random.split(key, 24)

    def w(k, shape, scale=0.05):
        return (scale * jax.random.normal(k, shape)).astype(jnp.float32)

    params = {
        # self-attention MHA (only linear_q and the output linear are used by the module)
        "Wq1": w(ks[0], (D, D)), "bq1": w(ks[1], (1, D)),
        "Wo1": w(ks[2], (D, D)), "bo1": w(ks[3], (1, D)),
        # cross-attention MHA
        "Wq2": w(ks[4], (D, D)), "bq2": w(ks[5], (1, D)),
        "Wo2": w(ks[6], (D, D)), "bo2": w(ks[7], (1, D)),
        # feedforward
        "W1": w(ks[8], (D, M)), "b1": w(ks[9], (1, M)),
        "W2": w(ks[10], (M, D)), "b2": w(ks[11], (1, D)),
        # normalization layers
        "g1": (1.0 + 0.1 * jax.random.normal(ks[12], (1, D))).astype(jnp.float32),
        "be1": w(ks[13], (1, D), 0.1),
        "g2": (1.0 + 0.1 * jax.random.normal(ks[14], (1, D))).astype(jnp.float32),
        "be2": w(ks[15], (1, D), 0.1),
        "g3": (1.0 + 0.1 * jax.random.normal(ks[16], (1, D))).astype(jnp.float32),
        "be3": w(ks[17], (1, D), 0.1),
    }

    target = (0.5 * jax.random.normal(ks[18], (B, T, D))).astype(jnp.float32)
    memory = (0.5 * jax.random.normal(ks[19], (B, S, D))).astype(jnp.float32)

    packed = pack_params(params)          # one-time host-side packing (bf16 weights, f32 vecs)

    out = decoder_forward(target, memory, packed)
    out = jax.block_until_ready(out)

    ref = decoder_reference(target, memory, params)
    ref = jax.block_until_ready(ref)

    assert out.shape == (B, T, D) and out.dtype == jnp.float32
    # bf16 MXU operands + the quirk-norm std divisions put the expected error in the low e-2
    # absolute range; drop the in-kernel .astype(bf16) casts to validate at <= 2e-2.
    if not jnp.allclose(out, ref, rtol=2e-2, atol=5e-2):
        max_err = float(jnp.max(jnp.abs(out - ref)))
        raise AssertionError(f"Pallas decoder mismatch vs reference, max |err| = {max_err}")

    print("KERNEL_OK")
</pallas_src>

<mosaic_0001>
module attributes {stable_mosaic.version = 11 : i64} {
  func.func @_decoder_kernel(%arg0: i32, %arg1: memref<2x8x128xf32, #tpu.memory_space<vmem>>, %arg2: memref<8x128xf32, #tpu.memory_space<vmem>>, %arg3: memref<4x128x128xbf16, #tpu.memory_space<vmem>>, %arg4: memref<16x128xf32, #tpu.memory_space<vmem>>, %arg5: memref<128x256xbf16, #tpu.memory_space<vmem>>, %arg6: memref<1x256xf32, #tpu.memory_space<vmem>>, %arg7: memref<256x128xbf16, #tpu.memory_space<vmem>>, %arg8: memref<2x8x128xf32, #tpu.memory_space<vmem>>) attributes {dimension_semantics = [#tpu.dimension_semantics<arbitrary>], iteration_bounds = array<i64: 1>, scalar_prefetch = 0 : i64, scratch_operands = 0 : i64, tpu.core_type = #tpu.core_type<tc>, window_params = [{pipeline_mode = #tpu.pipeline_mode<synchronous>, transform_indices = @transform_0, window_bounds = array<i64: 2, 8, 128>}, {transform_indices = @transform_1, window_bounds = array<i64: 8, 128>}, {pipeline_mode = #tpu.pipeline_mode<synchronous>, transform_indices = @transform_2, window_bounds = array<i64: 4, 128, 128>}, {pipeline_mode = #tpu.pipeline_mode<synchronous>, transform_indices = @transform_3, window_bounds = array<i64: 16, 128>}, {pipeline_mode = #tpu.pipeline_mode<synchronous>, transform_indices = @transform_4, window_bounds = array<i64: 128, 256>}, {pipeline_mode = #tpu.pipeline_mode<synchronous>, transform_indices = @transform_5, window_bounds = array<i64: 1, 256>}, {pipeline_mode = #tpu.pipeline_mode<synchronous>, transform_indices = @transform_6, window_bounds = array<i64: 256, 128>}, {pipeline_mode = #tpu.pipeline_mode<synchronous>, transform_indices = @transform_7, window_bounds = array<i64: 2, 8, 128>}]} {
    %c0 = arith.constant 0 : index
    %c0_0 = arith.constant 0 : index
    %c0_1 = arith.constant 0 : index
    %0 = vector.load %arg1[%c0, %c0_0, %c0_1] : memref<2x8x128xf32, #tpu.memory_space<vmem>>, vector<2x8x128xf32>
    %1 = vector.extract_strided_slice %0 {offsets = [0, 0, 0], sizes = [1, 8, 128], strides = [1, 1, 1]} : vector<2x8x128xf32> to vector<1x8x128xf32>
    %2 = vector.shape_cast %1 : vector<1x8x128xf32> to vector<8x128xf32>
    %3 = arith.truncf %2 : vector<8x128xf32> to vector<8x128xbf16>
    %c0_2 = arith.constant 0 : index
    %c0_3 = arith.constant 0 : index
    %c0_4 = arith.constant 0 : index
    %4 = vector.load %arg3[%c0_2, %c0_3, %c0_4] : memref<4x128x128xbf16, #tpu.memory_space<vmem>>, vector<1x128x128xbf16>
    %5 = vector.shape_cast %4 : vector<1x128x128xbf16> to vector<128x128xbf16>
    %cst = arith.constant dense<0.000000e+00> : vector<8x128xf32>
    %6 = tpu.matmul %3, %5, %cst {dimension_numbers = #tpu.dot_dimension_numbers<[1], [0], [0], [1], [0, 0, 1, 1], [], []>} : vector<8x128xbf16>, vector<128x128xbf16>, vector<8x128xf32> -> vector<8x128xf32>
    %c0_5 = arith.constant 0 : index
    %c0_6 = arith.constant 0 : index
    %7 = vector.load %arg4[%c0_5, %c0_6] : memref<16x128xf32, #tpu.memory_space<vmem>>, vector<1x128xf32>
    %8 = vector.broadcast %7 : vector<1x128xf32> to vector<8x128xf32>
    %9 = arith.addf %6, %8 : vector<8x128xf32>
    %10 = arith.truncf %9 : vector<8x128xf32> to vector<8x128xbf16>
    %cst_7 = arith.constant dense<0.000000e+00> : vector<8x8xf32>
    %11 = tpu.matmul %10, %10, %cst_7 {dimension_numbers = #tpu.dot_dimension_numbers<[1], [1], [0], [0], [0, 0, 1, 0], [], []>} : vector<8x128xbf16>, vector<8x128xbf16>, vector<8x8xf32> -> vector<8x8xf32>
    %cst_8 = arith.constant 0.0883883461 : f32
    %12 = vector.broadcast %cst_8 : f32 to vector<8x8xf32>
    %13 = arith.mulf %11, %12 : vector<8x8xf32>
    %cst_9 = arith.constant dense<0xFF800000> : vector<8xf32>
    %14 = vector.multi_reduction <maximumf>, %13, %cst_9 [1] : vector<8x8xf32> to vector<8xf32>
    %15 = vector.shape_cast %14 : vector<8xf32> to vector<8x1xf32>
    %16 = vector.broadcast %15 : vector<8x1xf32> to vector<8x8xf32>
    %17 = arith.subf %13, %16 : vector<8x8xf32>
    %18 = math.exp %17 : vector<8x8xf32>
    %cst_10 = arith.constant dense<0.000000e+00> : vector<8xf32>
    %19 = vector.multi_reduction <add>, %18, %cst_10 [1] : vector<8x8xf32> to vector<8xf32>
    %20 = vector.shape_cast %19 : vector<8xf32> to vector<8x1xf32>
    %21 = vector.broadcast %20 : vector<8x1xf32> to vector<8x8xf32>
    %22 = arith.divf %18, %21 : vector<8x8xf32>
    %23 = arith.truncf %22 : vector<8x8xf32> to vector<8x8xbf16>
    %cst_11 = arith.constant dense<0.000000e+00> : vector<8x128xf32>
    %24 = tpu.matmul %23, %10, %cst_11 {dimension_numbers = #tpu.dot_dimension_numbers<[1], [0], [0], [1], [0, 0, 1, 1], [], []>} : vector<8x8xbf16>, vector<8x128xbf16>, vector<8x128xf32> -> vector<8x128xf32>
    %25 = arith.truncf %24 : vector<8x128xf32> to vector<8x128xbf16>
    %c1 = arith.constant 1 : index
    %c0_12 = arith.constant 0 : index
    %c0_13 = arith.constant 0 : index
    %26 = vector.load %arg3[%c1, %c0_12, %c0_13] : memref<4x128x128xbf16, #tpu.memory_space<vmem>>, vector<1x128x128xbf16>
    %27 = vector.shape_cast %26 : vector<1x128x128xbf16> to vector<128x128xbf16>
    %cst_14 = arith.constant dense<0.000000e+00> : vector<8x128xf32>
    %28 = tpu.matmul %25, %27, %cst_14 {dimension_numbers = #tpu.dot_dimension_numbers<[1], [0], [0], [1], [0, 0, 1, 1], [], []>} : vector<8x128xbf16>, vector<128x128xbf16>, vector<8x128xf32> -> vector<8x128xf32>
    %c1_15 = arith.constant 1 : index
    %c0_16 = arith.constant 0 : index
    %29 = vector.load %arg4[%c1_15, %c0_16] : memref<16x128xf32, #tpu.memory_space<vmem>>, vector<1x128xf32>
    %30 = vector.broadcast %29 : vector<1x128xf32> to vector<8x128xf32>
    %31 = arith.addf %28, %30 : vector<8x128xf32>
    %c2 = arith.constant 2 : index
    %c0_17 = arith.constant 0 : index
    %32 = vector.load %arg4[%c2, %c0_17] : memref<16x128xf32, #tpu.memory_space<vmem>>, vector<1x128xf32>
    %c3 = arith.constant 3 : index
    %c0_18 = arith.constant 0 : index
    %33 = vector.load %arg4[%c3, %c0_18] : memref<16x128xf32, #tpu.memory_space<vmem>>, vector<1x128xf32>
    %cst_19 = arith.constant dense<0.000000e+00> : vector<8xf32>
    %34 = vector.multi_reduction <add>, %31, %cst_19 [1] : vector<8x128xf32> to vector<8xf32>
    %35 = vector.shape_cast %34 : vector<8xf32> to vector<8x1xf32>
    %cst_20 = arith.constant 1.280000e+02 : f32
    %36 = vector.broadcast %cst_20 : f32 to vector<8x1xf32>
    %37 = arith.divf %35, %36 : vector<8x1xf32>
    %38 = vector.broadcast %37 : vector<8x1xf32> to vector<8x128xf32>
    %39 = arith.subf %31, %38 : vector<8x128xf32>
    %40 = arith.mulf %39, %39 : vector<8x128xf32>
    %cst_21 = arith.constant dense<0.000000e+00> : vector<8xf32>
    %41 = vector.multi_reduction <add>, %40, %cst_21 [1] : vector<8x128xf32> to vector<8xf32>
    %42 = vector.shape_cast %41 : vector<8xf32> to vector<8x1xf32>
    %cst_22 = arith.constant 0.00787401571 : f32
    %43 = vector.broadcast %cst_22 : f32 to vector<8x1xf32>
    %44 = arith.mulf %42, %43 : vector<8x1xf32>
    %45 = vector.broadcast %37 : vector<8x1xf32> to vector<8x128xf32>
    %46 = arith.subf %31, %45 : vector<8x128xf32>
    %47 = math.sqrt %44 : vector<8x1xf32>
    %cst_23 = arith.constant 9.99999974E-6 : f32
    %48 = vector.broadcast %cst_23 : f32 to vector<8x1xf32>
    %49 = arith.addf %47, %48 : vector<8x1xf32>
    %50 = vector.broadcast %49 : vector<8x1xf32> to vector<8x128xf32>
    %51 = arith.divf %46, %50 : vector<8x128xf32>
    %52 = vector.broadcast %32 : vector<1x128xf32> to vector<8x128xf32>
    %53 = arith.mulf %52, %51 : vector<8x128xf32>
    %54 = vector.broadcast %33 : vector<1x128xf32> to vector<8x128xf32>
    %55 = arith.addf %53, %54 : vector<8x128xf32>
    %56 = vector.extract_strided_slice %55 {offsets = [0, 0], sizes = [1, 128], strides = [1, 1]} : vector<8x128xf32> to vector<1x128xf32>
    %c0_24 = arith.constant 0 : index
    %c0_25 = arith.constant 0 : index
    %57 = vector.load %arg2[%c0_24, %c0_25] : memref<8x128xf32, #tpu.memory_space<vmem>>, vector<2x128xf32>
    %58 = tpu.concatenate %56, %57 in 0 : vector<1x128xf32>, vector<2x128xf32> -> vector<3x128xf32>
    %59 = arith.truncf %58 : vector<3x128xf32> to vector<3x128xbf16>
    %c2_26 = arith.constant 2 : index
    %c0_27 = arith.constant 0 : index
    %c0_28 = arith.constant 0 : index
    %60 = vector.load %arg3[%c2_26, %c0_27, %c0_28] : memref<4x128x128xbf16, #tpu.memory_space<vmem>>, vector<1x128x128xbf16>
    %61 = vector.shape_cast %60 : vector<1x128x128xbf16> to vector<128x128xbf16>
    %cst_29 = arith.constant dense<0.000000e+00> : vector<3x128xf32>
    %62 = tpu.matmul %59, %61, %cst_29 {dimension_numbers = #tpu.dot_dimension_numbers<[1], [0], [0], [1], [0, 0, 1, 1], [], []>} : vector<3x128xbf16>, vector<128x128xbf16>, vector<3x128xf32> -> vector<3x128xf32>
    %c4 = arith.constant 4 : index
    %c0_30 = arith.constant 0 : index
    %63 = vector.load %arg4[%c4, %c0_30] : memref<16x128xf32, #tpu.memory_space<vmem>>, vector<1x128xf32>
    %64 = vector.broadcast %63 : vector<1x128xf32> to vector<3x128xf32>
    %65 = arith.addf %62, %64 : vector<3x128xf32>
    %66 = vector.extract_strided_slice %65 {offsets = [0, 0], sizes = [1, 128], strides = [1, 1]} : vector<3x128xf32> to vector<1x128xf32>
    %67 = vector.extract_strided_slice %65 {offsets = [1, 0], sizes = [2, 128], strides = [1, 1]} : vector<3x128xf32> to vector<2x128xf32>
    %cst_31 = arith.constant dense<0.000000e+00> : vector<1x2xf32>
    %68 = tpu.matmul %66, %67, %cst_31 {dimension_numbers = #tpu.dot_dimension_numbers<[1], [1], [0], [0], [0, 0, 1, 0], [], []>} : vector<1x128xf32>, vector<2x128xf32>, vector<1x2xf32> -> vector<1x2xf32>
    %cst_32 = arith.constant 0.0883883461 : f32
    %69 = vector.broadcast %cst_32 : f32 to vector<1x2xf32>
    %70 = arith.mulf %68, %69 : vector<1x2xf32>
    %cst_33 = arith.constant dense<0xFF800000> : vector<1xf32>
    %71 = vector.multi_reduction <maximumf>, %70, %cst_33 [1] : vector<1x2xf32> to vector<1xf32>
    %72 = vector.shape_cast %71 : vector<1xf32> to vector<1x1xf32>
    %73 = vector.broadcast %72 : vector<1x1xf32> to vector<1x2xf32>
    %74 = arith.subf %70, %73 : vector<1x2xf32>
    %75 = math.exp %74 : vector<1x2xf32>
    %cst_34 = arith.constant dense<0.000000e+00> : vector<1xf32>
    %76 = vector.multi_reduction <add>, %75, %cst_34 [1] : vector<1x2xf32> to vector<1xf32>
    %77 = vector.shape_cast %76 : vector<1xf32> to vector<1x1xf32>
    %78 = vector.broadcast %77 : vector<1x1xf32> to vector<1x2xf32>
    %79 = arith.divf %75, %78 : vector<1x2xf32>
    %cst_35 = arith.constant dense<0.000000e+00> : vector<1x128xf32>
    %80 = tpu.matmul %79, %67, %cst_35 {dimension_numbers = #tpu.dot_dimension_numbers<[1], [0], [0], [1], [0, 0, 1, 1], [], []>} : vector<1x2xf32>, vector<2x128xf32>, vector<1x128xf32> -> vector<1x128xf32>
    %81 = arith.truncf %80 : vector<1x128xf32> to vector<1x128xbf16>
    %c3_36 = arith.constant 3 : index
    %c0_37 = arith.constant 0 : index
    %c0_38 = arith.constant 0 : index
    %82 = vector.load %arg3[%c3_36, %c0_37, %c0_38] : memref<4x128x128xbf16, #tpu.memory_space<vmem>>, vector<1x128x128xbf16>
    %83 = vector.shape_cast %82 : vector<1x128x128xbf16> to vector<128x128xbf16>
    %cst_39 = arith.constant dense<0.000000e+00> : vector<1x128xf32>
    %84 = tpu.matmul %81, %83, %cst_39 {dimension_numbers = #tpu.dot_dimension_numbers<[1], [0], [0], [1], [0, 0, 1, 1], [], []>} : vector<1x128xbf16>, vector<128x128xbf16>, vector<1x128xf32> -> vector<1x128xf32>
    %c5 = arith.constant 5 : index
    %c0_40 = arith.constant 0 : index
    %85 = vector.load %arg4[%c5, %c0_40] : memref<16x128xf32, #tpu.memory_space<vmem>>, vector<1x128xf32>
    %86 = arith.addf %84, %85 : vector<1x128xf32>
    %c6 = arith.constant 6 : index
    %c0_41 = arith.constant 0 : index
    %87 = vector.load %arg4[%c6, %c0_41] : memref<16x128xf32, #tpu.memory_space<vmem>>, vector<1x128xf32>
    %c7 = arith.constant 7 : index
    %c0_42 = arith.constant 0 : index
    %88 = vector.load %arg4[%c7, %c0_42] : memref<16x128xf32, #tpu.memory_space<vmem>>, vector<1x128xf32>
    %cst_43 = arith.constant dense<0.000000e+00> : vector<1xf32>
    %89 = vector.multi_reduction <add>, %86, %cst_43 [1] : vector<1x128xf32> to vector<1xf32>
    %90 = vector.shape_cast %89 : vector<1xf32> to vector<1x1xf32>
    %cst_44 = arith.constant 1.280000e+02 : f32
    %91 = vector.broadcast %cst_44 : f32 to vector<1x1xf32>
    %92 = arith.divf %90, %91 : vector<1x1xf32>
    %93 = vector.broadcast %92 : vector<1x1xf32> to vector<1x128xf32>
    %94 = arith.subf %86, %93 : vector<1x128xf32>
    %95 = arith.mulf %94, %94 : vector<1x128xf32>
    %cst_45 = arith.constant dense<0.000000e+00> : vector<1xf32>
    %96 = vector.multi_reduction <add>, %95, %cst_45 [1] : vector<1x128xf32> to vector<1xf32>
    %97 = vector.shape_cast %96 : vector<1xf32> to vector<1x1xf32>
    %cst_46 = arith.constant 0.00787401571 : f32
    %98 = vector.broadcast %cst_46 : f32 to vector<1x1xf32>
    %99 = arith.mulf %97, %98 : vector<1x1xf32>
    %100 = vector.broadcast %92 : vector<1x1xf32> to vector<1x128xf32>
    %101 = arith.subf %86, %100 : vector<1x128xf32>
    %102 = math.sqrt %99 : vector<1x1xf32>
    %cst_47 = arith.constant 9.99999974E-6 : f32
    %103 = vector.broadcast %cst_47 : f32 to vector<1x1xf32>
    %104 = arith.addf %102, %103 : vector<1x1xf32>
    %105 = vector.broadcast %104 : vector<1x1xf32> to vector<1x128xf32>
    %106 = arith.divf %101, %105 : vector<1x128xf32>
    %107 = arith.mulf %87, %106 : vector<1x128xf32>
    %108 = arith.addf %107, %88 : vector<1x128xf32>
    %109 = vector.broadcast %108 : vector<1x128xf32> to vector<8x128xf32>
    %110 = arith.addf %55, %109 : vector<8x128xf32>
    %111 = vector.shape_cast %110 : vector<8x128xf32> to vector<1x8x128xf32>
    %112 = vector.broadcast %111 : vector<1x8x128xf32> to vector<2x8x128xf32>
    %113 = arith.addf %0, %112 : vector<2x8x128xf32>
    %114 = vector.shape_cast %113 : vector<2x8x128xf32> to vector<16x128xf32>
    %115 = arith.truncf %114 : vector<16x128xf32> to vector<16x128xbf16>
    %c0_48 = arith.constant 0 : index
    %c0_49 = arith.constant 0 : index
    %116 = vector.load %arg5[%c0_48, %c0_49] : memref<128x256xbf16, #tpu.memory_space<vmem>>, vector<128x256xbf16>
    %cst_50 = arith.constant dense<0.000000e+00> : vector<16x256xf32>
    %117 = tpu.matmul %115, %116, %cst_50 {dimension_numbers = #tpu.dot_dimension_numbers<[1], [0], [0], [1], [0, 0, 1, 1], [], []>} : vector<16x128xbf16>, vector<128x256xbf16>, vector<16x256xf32> -> vector<16x256xf32>
    %c0_51 = arith.constant 0 : index
    %c0_52 = arith.constant 0 : index
    %118 = vector.load %arg6[%c0_51, %c0_52] : memref<1x256xf32, #tpu.memory_space<vmem>>, vector<1x256xf32>
    %119 = vector.broadcast %118 : vector<1x256xf32> to vector<16x256xf32>
    %120 = arith.addf %117, %119 : vector<16x256xf32>
    %cst_53 = arith.constant 0.000000e+00 : f32
    %121 = vector.broadcast %cst_53 : f32 to vector<16x256xf32>
    %122 = arith.maximumf %120, %121 : vector<16x256xf32>
    %123 = arith.truncf %122 : vector<16x256xf32> to vector<16x256xbf16>
    %c0_54 = arith.constant 0 : index
    %c0_55 = arith.constant 0 : index
    %124 = vector.load %arg7[%c0_54, %c0_55] : memref<256x128xbf16, #tpu.memory_space<vmem>>, vector<256x128xbf16>
    %cst_56 = arith.constant dense<0.000000e+00> : vector<16x128xf32>
    %125 = tpu.matmul %123, %124, %cst_56 {dimension_numbers = #tpu.dot_dimension_numbers<[1], [0], [0], [1], [0, 0, 1, 1], [], []>} : vector<16x256xbf16>, vector<256x128xbf16>, vector<16x128xf32> -> vector<16x128xf32>
    %c8 = arith.constant 8 : index
    %c0_57 = arith.constant 0 : index
    %126 = vector.load %arg4[%c8, %c0_57] : memref<16x128xf32, #tpu.memory_space<vmem>>, vector<1x128xf32>
    %127 = vector.broadcast %126 : vector<1x128xf32> to vector<16x128xf32>
    %128 = arith.addf %125, %127 : vector<16x128xf32>
    %129 = vector.shape_cast %128 : vector<16x128xf32> to vector<2x8x128xf32>
    %cst_58 = arith.constant dense<0.000000e+00> : vector<2x128xf32>
    %130 = vector.multi_reduction <add>, %129, %cst_58 [1] : vector<2x8x128xf32> to vector<2x128xf32>
    %131 = vector.shape_cast %130 : vector<2x128xf32> to vector<2x1x128xf32>
    %cst_59 = arith.constant 8.000000e+00 : f32
    %132 = vector.broadcast %cst_59 : f32 to vector<2x1x128xf32>
    %133 = arith.divf %131, %132 : vector<2x1x128xf32>
    %cst_60 = arith.constant dense<0.000000e+00> : vector<2x8xf32>
    %134 = vector.multi_reduction <add>, %129, %cst_60 [2] : vector<2x8x128xf32> to vector<2x8xf32>
    %135 = vector.shape_cast %134 : vector<2x8xf32> to vector<2x8x1xf32>
    %cst_61 = arith.constant 1.280000e+02 : f32
    %136 = vector.broadcast %cst_61 : f32 to vector<2x8x1xf32>
    %137 = arith.divf %135, %136 : vector<2x8x1xf32>
    %138 = vector.broadcast %137 : vector<2x8x1xf32> to vector<2x8x128xf32>
    %139 = arith.subf %129, %138 : vector<2x8x128xf32>
    %140 = arith.mulf %139, %139 : vector<2x8x128xf32>
    %cst_62 = arith.constant dense<0.000000e+00> : vector<2x8xf32>
    %141 = vector.multi_reduction <add>, %140, %cst_62 [2] : vector<2x8x128xf32> to vector<2x8xf32>
    %142 = vector.shape_cast %141 : vector<2x8xf32> to vector<2x8x1xf32>
    %cst_63 = arith.constant 0.00787401571 : f32
    %143 = vector.broadcast %cst_63 : f32 to vector<2x8x1xf32>
    %144 = arith.mulf %142, %143 : vector<2x8x1xf32>
    %c9 = arith.constant 9 : index
    %c0_64 = arith.constant 0 : index
    %145 = vector.load %arg4[%c9, %c0_64] : memref<16x128xf32, #tpu.memory_space<vmem>>, vector<1x128xf32>
    %146 = vector.broadcast %133 : vector<2x1x128xf32> to vector<2x8x128xf32>
    %147 = arith.subf %129, %146 : vector<2x8x128xf32>
    %148 = math.sqrt %144 : vector<2x8x1xf32>
    %cst_65 = arith.constant 9.99999974E-6 : f32
    %149 = vector.broadcast %cst_65 : f32 to vector<2x8x1xf32>
    %150 = arith.addf %148, %149 : vector<2x8x1xf32>
    %151 = vector.broadcast %150 : vector<2x8x1xf32> to vector<2x8x128xf32>
    %152 = arith.divf %147, %151 : vector<2x8x128xf32>
    %153 = vector.shape_cast %145 : vector<1x128xf32> to vector<1x1x128xf32>
    %154 = vector.broadcast %153 : vector<1x1x128xf32> to vector<2x8x128xf32>
    %155 = arith.mulf %154, %152 : vector<2x8x128xf32>
    %c10 = arith.constant 10 : index
    %c0_66 = arith.constant 0 : index
    %156 = vector.load %arg4[%c10, %c0_66] : memref<16x128xf32, #tpu.memory_space<vmem>>, vector<1x128xf32>
    %157 = vector.shape_cast %156 : vector<1x128xf32> to vector<1x1x128xf32>
    %158 = vector.broadcast %157 : vector<1x1x128xf32> to vector<2x8x128xf32>
    %159 = arith.addf %155, %158 : vector<2x8x128xf32>
    %160 = arith.addf %113, %159 : vector<2x8x128xf32>
    %c0_67 = arith.constant 0 : index
    %c0_68 = arith.constant 0 : index
    %c0_69 = arith.constant 0 : index
    %161 = vector.load %arg8[%c0_67, %c0_68, %c0_69] : memref<2x8x128xf32, #tpu.memory_space<vmem>>, vector<2x8x128xf32>
    tpu.vector_store %arg8[%c0_67, %c0_68, %c0_69], %160 {strides = array<i32>} : memref<2x8x128xf32, #tpu.memory_space<vmem>>, vector<2x8x128xf32>,
    return
  }
  func.func @transform_0(%arg0: i32) -> (i32, i32, i32) {
    %c0_i32 = arith.constant 0 : i32
    %c0_i32_0 = arith.constant 0 : i32
    %c0_i32_1 = arith.constant 0 : i32
    %c0_i32_2 = arith.constant 0 : i32
    return %c0_i32, %c0_i32_0, %c0_i32_1 : i32, i32, i32
  }
  func.func @transform_1(%arg0: i32) -> (i32, i32) {
    %c0_i32 = arith.constant 0 : i32
    %c0_i32_0 = arith.constant 0 : i32
    %c0_i32_1 = arith.constant 0 : i32
    return %c0_i32, %c0_i32_0 : i32, i32
  }
  func.func @transform_2(%arg0: i32) -> (i32, i32, i32) {
    %c0_i32 = arith.constant 0 : i32
    %c0_i32_0 = arith.constant 0 : i32
    %c0_i32_1 = arith.constant 0 : i32
    %c0_i32_2 = arith.constant 0 : i32
    return %c0_i32, %c0_i32_0, %c0_i32_1 : i32, i32, i32
  }
  func.func @transform_3(%arg0: i32) -> (i32, i32) {
    %c0_i32 = arith.constant 0 : i32
    %c0_i32_0 = arith.constant 0 : i32
    %c0_i32_1 = arith.constant 0 : i32
    return %c0_i32, %c0_i32_0 : i32, i32
  }
  func.func @transform_4(%arg0: i32) -> (i32, i32) {
    %c0_i32 = arith.constant 0 : i32
    %c0_i32_0 = arith.constant 0 : i32
    %c0_i32_1 = arith.constant 0 : i32
    return %c0_i32, %c0_i32_0 : i32, i32
  }
  func.func @transform_5(%arg0: i32) -> (i32, i32) {
    %c0_i32 = arith.constant 0 : i32
    %c0_i32_0 = arith.constant 0 : i32
    %c0_i32_1 = arith.constant 0 : i32
    return %c0_i32, %c0_i32_0 : i32, i32
  }
  func.func @transform_6(%arg0: i32) -> (i32, i32) {
    %c0_i32 = arith.constant 0 : i32
    %c0_i32_0 = arith.constant 0 : i32
    %c0_i32_1 = arith.constant 0 : i32
    return %c0_i32, %c0_i32_0 : i32, i32
  }
  func.func @transform_7(%arg0: i32) -> (i32, i32, i32) {
    %c0_i32 = arith.constant 0 : i32
    %c0_i32_0 = arith.constant 0 : i32
    %c0_i32_1 = arith.constant 0 : i32
    %c0_i32_2 = arith.constant 0 : i32
    return %c0_i32, %c0_i32_0, %c0_i32_1 : i32, i32, i32
  }
}

</mosaic_0001>

<bundles_post_ra>
// kernel: tpu_custom_call.1
= control target key start
LH: loop header
LB: loop body
LE: loop exit
PB: predicated region body
PF: predicated region fallthrough
CT: control target
= control target key end

     0   :  { %12 = vsyncpa [#allocation3], 0  ;;  %s2071_s0 = inlined_call_operand.hbm [shape: f32[2,8,128], index: 0, kind: input, shape index: {}]   ;;  %s2072_s1 = inlined_call_operand.hbm [shape: f32[16,128], index: 1, kind: input, shape index: {}]   ;;  %s2073_s2 = inlined_call_operand.hbm [shape: bf16[4,128,128], index: 2, kind: input, shape index: {}]   ;;  %s2074_s3 = inlined_call_operand.hbm [shape: f32[16,128], index: 3, kind: input, shape index: {}]   ;;  %s2075_s4 = inlined_call_operand.hbm [shape: bf16[128,256], index: 4, kind: input, shape index: {}]   ;;  %s2076_s5 = inlined_call_operand.vmem [shape: f32[1,256], index: 5, kind: input, shape index: {}]   ;;  %s2077_s6 = inlined_call_operand.hbm [shape: bf16[256,128], index: 6, kind: input, shape index: {}]   ;;  %s2078_s7 = inlined_call_operand.hbm [shape: f32[2,8,128], index: 7, kind: output, shape index: {}]  }
   0x1   :  { %13 = vsyncpa [#allocation6], 0 }
   0x2   :  { %14 = vsyncpa [#allocation9], 0 }
   0x3   :  { %15 = vsyncpa [#allocation12], 0 }
   0x4   :  { %16 = vsyncpa [#allocation4], 0  ;;  %s1822_s24 = smov [#allocation5]   ;;  %s1658_s28 = scalar_lea.hbm %s2072_s1, 128 }
   0x5   :  { %s35_s25 = sshll.u32 %s1822_s24, 4  ;;  %p1659_p0 = scmp.ne.s32.totalorder %s2072_s1, %s1658_s28  ;;  %s36_s25 = int_to_ptr.vmem [resolvable:$true] %s35_s25 }
   0x6   :  { %s1660_s10 = scalar_lea.hbm %s2072_s1, 256  ;;  %p1662_p2 = scmp.lt.u32.totalorder %s1658_s28, %s2072_s1 }
   0x7   :  { %p1661_p1 = scmp.lt.u32.totalorder %s1660_s10, %s1658_s28 }
   0x9   :  { %p1663_p3 = por %p1662_p2, %p1661_p1 }
   0xb   :  { %p1664_p4 = pnand %p1663_p3, %p1659_p0 }
   0xd   :  { %1667 = shalt.err (!%p1664_p4)
}
   0xe   :  { %s1668_s13 = scalar_lea.vmem %s36_s25, 128  ;;  %p1673_p6 = scmp.lt.s32.totalorder %s36_s25, %s36_s25 }
   0xf   :  { %p1669_p5 = scmp.ne.s32.totalorder %s36_s25, %s1668_s13  ;;  %p1674_p7 = scmp.lt.s32.totalorder %s1668_s13, %s1668_s13 }
  0x11   :  { %p1675_p8 = por %p1674_p7, %p1673_p6 }
  0x13   :  { %p1676_p9 = pnand %p1675_p8, %p1669_p5 }
  0x15   :  { %1679 = shalt.err (!%p1676_p9)
}
  0x16   :  { %38 = dma.hbm_to_vmem [thread:$0]  %s2072_s1, 128, %s36_s25, [#allocation6]  }
  0x17   :  { %s1823_s16 = smov [#allocation8]   ;;  %s1824_s18 = smov [#allocation2]  }
  0x18   :  { %s56_s17 = sshll.u32 %s1823_s16, 4  ;;  %s22_s19 = sshll.u32 %s1824_s18, 4  ;;  %s57_s17 = int_to_ptr.vmem [resolvable:$true] %s56_s17  ;;  %s23_s19 = int_to_ptr.vmem [resolvable:$true] %s22_s19 }
  0x19   :  { %s1680_s22 = scalar_lea.hbm %s2074_s3, 256 }
  0x1a   :  { %p1681_p10 = scmp.ne.s32.totalorder %s2074_s3, %s1680_s22  ;;  %p1684_p11 = scmp.lt.u32.totalorder %s1680_s22, %s2074_s3 }
  0x1c   :  { %p1686_p12 = pnand %p1684_p11, %p1681_p10 }
  0x1e   :  { %1689 = shalt.err (!%p1686_p12)
}
  0x1f   :  { %s1690_s1 = scalar_lea.vmem %s57_s17, 256  ;;  %p1695_p0 = scmp.lt.s32.totalorder %s57_s17, %s57_s17 }
  0x20   :  { %p1691_p13 = scmp.ne.s32.totalorder %s57_s17, %s1690_s1  ;;  %p1696_p1 = scmp.lt.s32.totalorder %s1690_s1, %s1690_s1 }
  0x22   :  { %p1697_p2 = por %p1696_p1, %p1695_p0 }
  0x24   :  { %p1698_p3 = pnand %p1697_p2, %p1691_p13 }
  0x26   :  { %1701 = shalt.err (!%p1698_p3)
}
  0x27   :  { %s1825_s25 = smov 128   ;;  %s1826_s28 = smov 8  }
  0x28   :  { %62 = dma.hbm_to_vmem [thread:$0]  %s2074_s3, 256, %s57_s17, [#allocation9], %s1825_s25, %s1825_s25, %s1826_s28  }
  0x29   :  { %s1702_s10 = scalar_lea.hbm %s2071_s0, 256 }
  0x2a   :  { %p1703_p4 = scmp.ne.s32.totalorder %s2071_s0, %s1702_s10  ;;  %p1706_p5 = scmp.lt.u32.totalorder %s1702_s10, %s2071_s0 }
  0x2c   :  { %p1708_p6 = pnand %p1706_p5, %p1703_p4 }
  0x2e   :  { %1711 = shalt.err (!%p1708_p6)
}
  0x2f   :  { %s1712_s15 = scalar_lea.vmem %s23_s19, 256  ;;  %p1717_p8 = scmp.lt.s32.totalorder %s23_s19, %s23_s19 }
  0x30   :  { %p1713_p7 = scmp.ne.s32.totalorder %s23_s19, %s1712_s15  ;;  %p1718_p9 = scmp.lt.s32.totalorder %s1712_s15, %s1712_s15 }
  0x32   :  { %p1719_p10 = por %p1718_p9, %p1717_p8 }
  0x34   :  { %p1720_p11 = pnand %p1719_p10, %p1713_p7 }
  0x36   :  { %1723 = shalt.err (!%p1720_p11)
}
  0x37   :  { %28 = dma.hbm_to_vmem [thread:$0]  %s2071_s0, 256, %s23_s19, [#allocation3], %s1825_s25, %s1825_s25, %s1826_s28  }
  0x38   :  { %s1827_s17 = smov [#allocation7]   ;;  %s1724_s22 = scalar_lea.hbm %s2073_s2, 4096 }
  0x39   :  { %s44_s18 = sshll.u32 %s1827_s17, 4  ;;  %p1725_p12 = scmp.ne.s32.totalorder %s2073_s2, %s1724_s22  ;;  %s45_s18 = int_to_ptr.vmem [resolvable:$true] %s44_s18 }
  0x3a   :  { %p1728_p13 = scmp.lt.u32.totalorder %s1724_s22, %s2073_s2 }
  0x3c   :  { %p1730_p0 = pnand %p1728_p13, %p1725_p12 }
  0x3e   :  { %1733 = shalt.err (!%p1730_p0)
}
  0x3f   :  { %s1734_s1 = scalar_lea.vmem %s45_s18, 4096  ;;  %p1739_p2 = scmp.lt.s32.totalorder %s45_s18, %s45_s18 }
  0x40   :  { %p1735_p1 = scmp.ne.s32.totalorder %s45_s18, %s1734_s1  ;;  %p1740_p3 = scmp.lt.s32.totalorder %s1734_s1, %s1734_s1 }
  0x42   :  { %p1741_p4 = por %p1740_p3, %p1739_p2 }
  0x44   :  { %p1742_p5 = pnand %p1741_p4, %p1735_p1 }
  0x46   :  { %1745 = shalt.err (!%p1742_p5)
}
  0x47   :  { %s1828_s0 = smov 64   ;;  %s1829_s19 = smov 4  }
  0x48   :  { %50 = dma.hbm_to_vmem [thread:$0]  %s2073_s2, 4096, %s45_s18, [#allocation6], %s1828_s0, %s1828_s0, %s1829_s19  }
  0x49   :  { %s1830_s8 = smov [#allocation10]   ;;  %s1831_s10 = smov [#allocation11]  }
  0x4a   :  { %s68_s9 = sshll.u32 %s1830_s8, 4  ;;  %s82_s11 = sshll.u32 %s1831_s10, 4  ;;  %s69_s9 = int_to_ptr.vmem [resolvable:$true] %s68_s9  ;;  %s1936_s11 = int_to_ptr.vmem [resolvable:$true] %s82_s11 }
  0x4b   :  { %s1746_s14 = scalar_lea.hbm %s2075_s4, 2048 }
  0x4c   :  { %p1747_p6 = scmp.ne.s32.totalorder %s2075_s4, %s1746_s14  ;;  %p1750_p7 = scmp.lt.u32.totalorder %s1746_s14, %s2075_s4 }
  0x4e   :  { %p1752_p8 = pnand %p1750_p7, %p1747_p6 }
  0x50   :  { %1755 = shalt.err (!%p1752_p8)
}
  0x51   :  { %s1756_s2 = scalar_lea.vmem %s69_s9, 2048  ;;  %p1761_p10 = scmp.lt.s32.totalorder %s69_s9, %s69_s9 }
  0x52   :  { %p1757_p9 = scmp.ne.s32.totalorder %s69_s9, %s1756_s2  ;;  %p1762_p11 = scmp.lt.s32.totalorder %s1756_s2, %s1756_s2 }
  0x54   :  { %p1763_p12 = por %p1762_p11, %p1761_p10 }
  0x56   :  { %p1764_p13 = pnand %p1763_p12, %p1757_p9 }
  0x58   :  { %1767 = shalt.err (!%p1764_p13)
}
  0x59   :  { %74 = dma.hbm_to_vmem [thread:$0]  %s2075_s4, 2048, %s69_s9, [#allocation9], %s1825_s25, %s1825_s25, %s1826_s28  }
  0x5a   :  { %s1768_s23 = scalar_lea.hbm %s2077_s6, 2048 }
  0x5b   :  { %p1769_p0 = scmp.ne.s32.totalorder %s2077_s6, %s1768_s23  ;;  %p1772_p1 = scmp.lt.u32.totalorder %s1768_s23, %s2077_s6 }
  0x5d   :  { %p1774_p2 = pnand %p1772_p1, %p1769_p0 }
  0x5f   :  { %1777 = shalt.err (!%p1774_p2)
}
  0x60   :  { %s1778_s29 = scalar_lea.vmem %s1936_s11, 2048  ;;  %p1783_p4 = scmp.lt.s32.totalorder %s1936_s11, %s1936_s11 }
  0x61   :  { %p1779_p3 = scmp.ne.s32.totalorder %s1936_s11, %s1778_s29  ;;  %p1784_p5 = scmp.lt.s32.totalorder %s1778_s29, %s1778_s29 }
  0x63   :  { %p1785_p6 = por %p1784_p5, %p1783_p4 }
  0x65   :  { %p1786_p7 = pnand %p1785_p6, %p1779_p3 }
  0x67   :  { %1789 = shalt.err (!%p1786_p7)
}
  0x68   :  { %88 = dma.hbm_to_vmem [thread:$0]  %s2077_s6, 2048, %s1936_s11, [#allocation12], %s1828_s0, %s1828_s0, %s1829_s19  }
  0x69   :  { %1812 = dma.done.wait [#allocation3], 256  }
  0x6a   :  { %1813 = vsyncadd [#allocation3], 4294967040 }
  0x6b   :  { %1814 = dma.done.wait [#allocation6], 4224  }
  0x6c   :  { %1815 = vsyncadd [#allocation6], 4294963072 }
  0x6d   :  { %1816 = dma.done.wait [#allocation9], 2304  }
  0x6e   :  { %1817 = vsyncadd [#allocation9], 4294964992 }
  0x6f   :  { %1818 = dma.done.wait [#allocation12], 2048  }
  0x70   :  { %1819 = vsyncadd [#allocation12], 4294965248  ;;  %v1832_v0 = vmov 0.0   ;;  %vm1833_vm0 = vmmov 0   ;;  %v1562_v1 = vld [vmem:[#allocation7] sm:$0xff]   ;;  %v1563_v2 = vld [vmem:[#allocation7 + $0x8] sm:$0xff]  }
  0x71   :  { %1446 = vmatprep.subr.bf16.mxu0 %v1832_v0  ;;  %1462 = vmatprep.mubr.msk.bf16.mxu0 %vm1833_vm0, %v1832_v0  ;;  %v1564_v3 = vld [vmem:[#allocation7 + $0x10] sm:$0xff]   ;;  %v1565_v4 = vld [vmem:[#allocation7 + $0x18] sm:$0xff]   ;;  %v1566_v5 = vld [vmem:[#allocation7 + $0x20] sm:$0xff]   ;;  %vm278_vm1 = vcmask 1043456   ;;  %vm262_vm2 = vcmask 64512   ;;  %vm468_vm5 = vcmask 1040384  }
  0x72   :  { %1472 = vmatprep.subr.bf16.mxu1 %v1832_v0  ;;  %1474 = vmatprep.mubr.msk.bf16.mxu1 %vm1833_vm0, %v1832_v0  ;;  %v1567_v6 = vld [vmem:[#allocation7 + $0x28] sm:$0xff]   ;;  %v1568_v7 = vld [vmem:[#allocation7 + $0x30] sm:$0xff]   ;;  %v1569_v8 = vld [vmem:[#allocation7 + $0x38] sm:$0xff]   ;;  %vm671_vm6 = vcmask 1041408   ;;  %vm655_vm7 = vcmask 8192   ;;  %vm667_vm8 = vcmask 15360  }
  0x73   :  { %1447 = vmatpush3.bf16.msra.mxu0 %v1562_v1  ;;  %v1985_v9 = vld [vmem:[#allocation2] sm:$0xff]  ;;  %v1305_v11 = vld [vmem:[#allocation8] ss:$0 sm:$0xff]  ;;  %v1572_v36 = vld [vmem:[#allocation7 + $0x50] sm:$0xff]  }
  0x74   :  { %1448 = vmatprep.subr.bf16.mxu0 %v1832_v0  ;;  %v110_v10 = vpack.c.bf16 %v1985_v9, %v1985_v9  ;;  %v1570_v33 = vld [vmem:[#allocation7 + $0x40] sm:$0xff]   ;;  %v1571_v35 = vld [vmem:[#allocation7 + $0x48] sm:$0xff]   ;;  %v1573_v37 = vld [vmem:[#allocation7 + $0x58] sm:$0xff]  }
  0x75   :  { %v1574_v38 = vld [vmem:[#allocation7 + $0x60] sm:$0xff]   ;;  %v1575_v39 = vld [vmem:[#allocation7 + $0x68] sm:$0xff]   ;;  %v1576_v40 = vld [vmem:[#allocation7 + $0x70] sm:$0xff]  }
  0x76   :  { %v1577_v41 = vld [vmem:[#allocation7 + $0x78] sm:$0xff]   ;;  %v1315_v47 = vld [vmem:[#allocation8 + $0x1] ss:$0 sm:$0xff]  ;;  %v1579_v58 = vld [vmem:[#allocation7 + $0x88] sm:$0xff]  }
  0x77   :  { %1449 = vmatpush3.bf16.msra.mxu0 %v1563_v2  ;;  %v1578_v57 = vld [vmem:[#allocation7 + $0x80] sm:$0xff]   ;;  %v1580_v59 = vld [vmem:[#allocation7 + $0x90] sm:$0xff]   ;;  %v1581_v60 = vld [vmem:[#allocation7 + $0x98] sm:$0xff]  }
  0x78   :  { %1450 = vmatprep.subr.bf16.mxu0 %v1832_v0  ;;  %v1582_v61 = vld [vmem:[#allocation7 + $0xa0] sm:$0xff]   ;;  %v1583_v62 = vld [vmem:[#allocation7 + $0xa8] sm:$0xff]   ;;  %v1584_v63 = vld [vmem:[#allocation7 + $0xb0] sm:$0xff]  }
  0x79   :  { %v1585_v1 = vld [vmem:[#allocation7 + $0xb8] sm:$0xff]  }
  0x7b   :  { %1451 = vmatpush3.bf16.msra.mxu0 %v1564_v3 }
  0x7c   :  { %1452 = vmatprep.subr.bf16.mxu0 %v1832_v0 }
  0x7f   :  { %1453 = vmatpush3.bf16.msra.mxu0 %v1565_v4 }
  0x80   :  { %1454 = vmatprep.subr.bf16.mxu0 %v1832_v0 }
  0x83   :  { %1455 = vmatpush3.bf16.msra.mxu0 %v1566_v5 }
  0x84   :  { %1456 = vmatprep.subr.bf16.mxu0 %v1832_v0 }
  0x87   :  { %1457 = vmatpush3.bf16.msra.mxu0 %v1567_v6 }
  0x88   :  { %1458 = vmatprep.subr.bf16.mxu0 %v1832_v0 }
  0x8b   :  { %1459 = vmatpush3.bf16.msra.mxu0 %v1568_v7 }
  0x8c   :  { %1460 = vmatprep.subr.bf16.mxu0 %v1832_v0 }
  0x8f   :  { %1461 = vmatpush3.bf16.msra.mxu0 %v1569_v8 }
  0x90   :  { %1466 = vmatprep.subr.bf16.mxu0 %v1832_v0 }
  0x92   :  { %1463 = vmatmul.mubr.bf16.vlgmr.msra.gmra.mrb[0].mxu0 %v110_v10 }
  0x93   :  { %1468 = vmatprep.mubr.msk.bf16.mxu0 %vm1833_vm0, %v1832_v0 }
 0x165   :  { %v214_v12 = vpop.f32.mrb[0].mxu0 }
 0x166   :  { %v215_v13 = vadd.f32 %v1305_v11, %v214_v12  ;;  %v1464_v14 = vpop.f32.mrb[1].mxu0  ;;  %v1324_v12 = vld [vmem:[#allocation8 + $0x2] ss:$0 sm:$0xff] }
 0x167   :  { %v217_v15 = vpop.f32.mrb[2].mxu0 }
 0x168   :  { %v220_v16 = vpack.c.bf16 %v215_v13, %v215_v13  ;;  %v1465_v17 = vpop.f32.mrb[3].mxu0  ;;  %v464_v13 = vld [vmem:[#allocation5] sm:$0x3]  ;;  %v1325_v15 = vld [vmem:[#allocation8 + $0x3] ss:$0 sm:$0xff] }
 0x169   :  { %v466_v17 = vrot.slane %v464_v13, 7  ;;  %v1614_v13 = vld [vmem:[#allocation10 + $0x64] ss:$8 sps:$4 sm:$0xff]  }
 0x16a   :  { %1467 = vmatpush3.bf16.xpose.msra.mxu0 %v220_v16  ;;  %v280_v18 = vsel %vm278_vm1, %v220_v16, 0 }
 0x16b   :  { %1473 = vmatpush3.bf16.msra.mxu1 %v280_v18  ;;  %1498 = vmatprep.subr.bf16.mxu0 %v1832_v0 }
 0x16c   :  { %1478 = vmatprep.subr.bf16.mxu1 %v1832_v0 }
 0x171   :  { %1469 = vmatmul.mubr.bf16.vlgmr.msra.gmra.mrb[4].mxu0 %v220_v16 }
 0x172   :  { %1514 = vmatprep.mubr.msk.bf16.mxu0 %vm1833_vm0, %v1832_v0  ;;  %1499 = vmatpush3.bf16.msra.mxu0 %v1578_v57 }
 0x173   :  { %1500 = vmatprep.subr.bf16.mxu0 %v1832_v0 }
 0x176   :  { %1501 = vmatpush3.bf16.msra.mxu0 %v1579_v58 }
 0x177   :  { %1502 = vmatprep.subr.bf16.mxu0 %v1832_v0 }
 0x17a   :  { %1503 = vmatpush3.bf16.msra.mxu0 %v1580_v59 }
 0x17b   :  { %1504 = vmatprep.subr.bf16.mxu0 %v1832_v0 }
 0x17e   :  { %1505 = vmatpush3.bf16.msra.mxu0 %v1581_v60 }
 0x17f   :  { %1506 = vmatprep.subr.bf16.mxu0 %v1832_v0 }
 0x182   :  { %1507 = vmatpush3.bf16.msra.mxu0 %v1582_v61 }
 0x183   :  { %1508 = vmatprep.subr.bf16.mxu0 %v1832_v0 }
 0x186   :  { %1509 = vmatpush3.bf16.msra.mxu0 %v1583_v62  ;;  %v1596_v62 = vld [vmem:[#allocation10 + $0x4] ss:$8 sps:$4 sm:$0xff]  }
 0x187   :  { %1510 = vmatprep.subr.bf16.mxu0 %v1832_v0 }
 0x18a   :  { %1511 = vmatpush3.bf16.msra.mxu0 %v1584_v63  ;;  %v1594_v63 = vld [vmem:[#allocation10] ss:$8 sps:$4 sm:$0xff]  }
 0x18b   :  { %1512 = vmatprep.subr.bf16.mxu0 %v1832_v0 }
 0x18e   :  { %1513 = vmatpush3.bf16.msra.mxu0 %v1585_v1  ;;  %v1599_v1 = vld [vmem:[#allocation10 + $0x14] ss:$8 sps:$4 sm:$0xff]  }
 0x18f   :  { %991 = vmatprep.subr.bf16.mxu0 %v1596_v62 }
 0x244   :  { %v255_v19 = vpop.f32.mrb[4].mxu0 }
 0x245   :  { %v261_v20 = vmul.f32 0.088388346, %v255_v19  ;;  %v1470_v21 = vpop.f32.mrb[5].mxu0 }
 0x246   :  { %v258_v22 = vpop.f32.mrb[6].mxu0  ;;  %v1326_v21 = vld [vmem:[#allocation8 + $0x4] ss:$0 sm:$0xff] }
 0x247   :  { %v1471_v23 = vpop.f32.mrb[7].mxu0  ;;  %v263_v24 = vsel %vm262_vm2, %v261_v20, -inf }
 0x248   :  { %264 = vmax.xlane.f32.xlu0 %v263_v24 }
 0x2d5   :  { %v265_v25 = vpop.xlane.xlu0 %264 }
 0x2d6   :  { %v266_v26 = vsub.f32 %v261_v20, %v265_v25 }
 0x2d8   :  { %v267_v27 = vmul.f32 1.442695, %v266_v26 }
 0x2da   :  { %1634 = vpow2.f32 %v267_v27 }
 0x2e4   :  { %v1635_v28 = vpop.eup %1634 }
 0x2e5   :  { %v269_v29 = vsel %vm262_vm2, %v1635_v28, 0.0 }
 0x2e6   :  { %270 = vadd.xlane.f32.xlu0 %v269_v29 }
 0x373   :  { %v271_v30 = vpop.xlane.xlu0 %270 }
 0x374   :  { %1636 = vrcp.f32 %v271_v30 }
 0x37e   :  { %v1637_v31 = vpop.eup %1636 }
 0x37f   :  { %v273_v32 = vmul.f32 %v1637_v31, %v1635_v28 }
 0x381   :  { %v274_v34 = vpack.c.bf16 %v273_v32, %v273_v32 }
 0x383   :  { %1475 = vmatmul.mubr.msk.bf16.vlgmr.msra.gmra.mrb[0].mxu1 %vm262_vm2, %v274_v34 }
 0x384   :  { %1479 = vmatpush3.bf16.msra.mxu1 %v1570_v33  ;;  %1494 = vmatprep.mubr.msk.bf16.mxu1 %vm1833_vm0, %v1832_v0 }
 0x385   :  { %1480 = vmatprep.subr.bf16.mxu1 %v1832_v0 }
 0x388   :  { %1481 = vmatpush3.bf16.msra.mxu1 %v1571_v35 }
 0x389   :  { %1482 = vmatprep.subr.bf16.mxu1 %v1832_v0 }
 0x38c   :  { %1483 = vmatpush3.bf16.msra.mxu1 %v1572_v36 }
 0x38d   :  { %1484 = vmatprep.subr.bf16.mxu1 %v1832_v0 }
 0x390   :  { %1485 = vmatpush3.bf16.msra.mxu1 %v1573_v37 }
 0x391   :  { %1486 = vmatprep.subr.bf16.mxu1 %v1832_v0 }
 0x394   :  { %1487 = vmatpush3.bf16.msra.mxu1 %v1574_v38 }
 0x395   :  { %1488 = vmatprep.subr.bf16.mxu1 %v1832_v0 }
 0x398   :  { %1489 = vmatpush3.bf16.msra.mxu1 %v1575_v39  ;;  %v1586_v39 = vld [vmem:[#allocation7 + $0xc0] sm:$0xff]  }
 0x399   :  { %1490 = vmatprep.subr.bf16.mxu1 %v1832_v0 }
 0x39c   :  { %1491 = vmatpush3.bf16.msra.mxu1 %v1576_v40 }
 0x39d   :  { %1492 = vmatprep.subr.bf16.mxu1 %v1832_v0 }
 0x3a0   :  { %1493 = vmatpush3.bf16.msra.mxu1 %v1577_v41  ;;  %v1587_v41 = vld [vmem:[#allocation7 + $0xc8] sm:$0xff]  }
 0x3a1   :  { %1518 = vmatprep.subr.mxu1 %v1832_v0 }
 0x456   :  { %v316_v42 = vpop.f32.mrb[0].mxu1 }
 0x457   :  { %v322_v43 = vpack.c.bf16 %v316_v42, %v316_v42  ;;  %v1476_v44 = vpop.f32.mrb[1].mxu1  ;;  %v1588_v42 = vld [vmem:[#allocation7 + $0xd0] sm:$0xff]  }
 0x458   :  { %v319_v45 = vpop.f32.mrb[2].mxu1  ;;  %v1590_v44 = vld [vmem:[#allocation7 + $0xe0] sm:$0xff]  }
 0x459   :  { %v1477_v46 = vpop.f32.mrb[3].mxu1  ;;  %1495 = vmatmul.mubr.bf16.vlgmr.msra.gmra.mrb[4].mxu1 %v322_v43  ;;  %v1589_v43 = vld [vmem:[#allocation7 + $0xd8] sm:$0xff]   ;;  %v1591_v45 = vld [vmem:[#allocation7 + $0xe8] sm:$0xff]  }
 0x45a   :  { %1520 = vmatprep.mubr.msk.f32.mxu1 %vm1833_vm0, %v1832_v0  ;;  %v1592_v46 = vld [vmem:[#allocation7 + $0xf0] sm:$0xff]  }
 0x52c   :  { %v427_v48 = vpop.f32.mrb[4].mxu1 }
 0x52d   :  { %v428_v49 = vadd.f32 %v1315_v47, %v427_v48  ;;  %v1496_v50 = vpop.f32.mrb[5].mxu1  ;;  %v1593_v47 = vld [vmem:[#allocation7 + $0xf8] sm:$0xff]  }
 0x52e   :  { %v430_v51 = vpop.f32.mrb[6].mxu1 }
 0x52f   :  { %435 = vadd.xlane.f32.xlu1 %v428_v49  ;;  %v1497_v52 = vpop.f32.mrb[7].mxu1  ;;  %v762_v51 = vld [vmem:[#allocation8 + $0x5] sm:$0x1] }
 0x5bc   :  { %v436_v53 = vpop.xlane.xlu1 %435 }
 0x5bd   :  { %v438_v54 = vmul.f32 0.0078125, %v436_v53 }
 0x5bf   :  { %v439_v55 = vsub.f32 %v428_v49, %v438_v54 }
 0x5c1   :  { %v440_v56 = vmul.f32 %v439_v55, %v439_v55 }
 0x5c3   :  { %441 = vadd.xlane.f32.xlu1 %v440_v56 }
 0x650   :  { %v442_v2 = vpop.xlane.xlu1 %441 }
 0x651   :  { %v443_v3 = vmul.f32 0.007874016, %v442_v2  ;;  %v1597_v2 = vld [vmem:[#allocation10 + $0x10] ss:$8 sps:$4 sm:$0xff]  }
 0x653   :  { %1638 = vrsqrt.f32 %v443_v3  ;;  %vm446_vm3 = vcmp.eq.f32.partialorder %v443_v3, inf  ;;  %v449_v6 = vand.u32 2147483648, %v443_v3  ;;  %vm448_vm4 = vcmp.eq.f32.partialorder %v443_v3, 0.0 }
 0x65d   :  { %v1639_v4 = vpop.eup %1638 }
 0x65e   :  { %v445_v5 = vmul.f32 %v1639_v4, %v443_v3  ;;  %v1600_v4 = vld [vmem:[#allocation10 + $0x20] ss:$8 sps:$4 sm:$0xff]  }
 0x660   :  { %v447_v7 = vsel %vm446_vm3, %v443_v3, %v445_v5  ;;  %v1602_v3 = vld [vmem:[#allocation10 + $0x24] ss:$8 sps:$4 sm:$0xff]   ;;  %v1605_v5 = vld [vmem:[#allocation10 + $0x34] ss:$8 sps:$4 sm:$0xff]  }
 0x661   :  { %v450_v8 = vsel %vm448_vm4, %v449_v6, %v447_v7  ;;  %v1603_v6 = vld [vmem:[#allocation10 + $0x30] ss:$8 sps:$4 sm:$0xff]   ;;  %v1608_v7 = vld [vmem:[#allocation10 + $0x44] ss:$8 sps:$4 sm:$0xff]  }
 0x662   :  { %v451_v10 = vadd.f32 1e-05, %v450_v8  ;;  %v1834_v8 = vmov 0  }
 0x664   :  { %1640 = vrcp.f32 %v451_v10  ;;  %v1606_v10 = vld [vmem:[#allocation10 + $0x40] ss:$8 sps:$4 sm:$0xff]  }
 0x66e   :  { %v1641_v11 = vpop.eup %1640 }
 0x66f   :  { %v453_v14 = vmul.f32 %v1641_v11, %v439_v55  ;;  %v1611_v11 = vld [vmem:[#allocation10 + $0x54] ss:$8 sps:$4 sm:$0xff]  }
 0x671   :  { %v458_v16 = vmul.f32 %v1324_v12, %v453_v14  ;;  %v1609_v12 = vld [vmem:[#allocation10 + $0x50] ss:$8 sps:$4 sm:$0xff]   ;;  %v1612_v14 = vld [vmem:[#allocation10 + $0x60] ss:$8 sps:$4 sm:$0xff]  }
 0x673   :  { %v2019_v18 = vadd.f32 %v1325_v15, %v458_v16  ;;  %v1617_v15 = vld [vmem:[#allocation10 + $0x74] ss:$8 sps:$4 sm:$0xff]   ;;  %v1615_v16 = vld [vmem:[#allocation10 + $0x70] ss:$8 sps:$4 sm:$0xff]  }
 0x675   :  { %v469_v19 = vsel %vm468_vm5, %v2019_v18, %v466_v17  ;;  %v1618_v17 = vld [vmem:[#allocation11 + $0x40] sm:$0xff]  }
 0x676   :  { %v470_v20 = vpack.c.bf16 %v469_v19, %v469_v19  ;;  %v1619_v19 = vld [vmem:[#allocation11] sm:$0xff]  }
 0x678   :  { %1515 = vmatmul.mubr.bf16.vlgmr.msra.gmra.mrb[8].mxu0 %v470_v20  ;;  %v1620_v20 = vld [vmem:[#allocation11 + $0x48] sm:$0xff]  }
 0x679   :  { %992 = vmatpush1.bf16.msra.mxu0 %v1594_v63  ;;  %1023 = vmatprep.mubr.bf16.mxu0 %v1834_v8 }
 0x67a   :  { %993 = vmatprep.subr.bf16.mxu0 %v1599_v1 }
 0x67d   :  { %994 = vmatpush1.bf16.msra.mxu0 %v1597_v2 }
 0x67e   :  { %995 = vmatprep.subr.bf16.mxu0 %v1602_v3 }
 0x681   :  { %996 = vmatpush1.bf16.msra.mxu0 %v1600_v4 }
 0x682   :  { %997 = vmatprep.subr.bf16.mxu0 %v1605_v5 }
 0x685   :  { %998 = vmatpush1.bf16.msra.mxu0 %v1603_v6 }
 0x686   :  { %999 = vmatprep.subr.bf16.mxu0 %v1608_v7 }
 0x689   :  { %1000 = vmatpush1.bf16.msra.mxu0 %v1606_v10 }
 0x68a   :  { %1001 = vmatprep.subr.bf16.mxu0 %v1611_v11  ;;  %v1361_v11 = vld [vmem:[#allocation8 + $0x8] ss:$0 sm:$0xff] }
 0x68d   :  { %1002 = vmatpush1.bf16.msra.mxu0 %v1609_v12 }
 0x68e   :  { %1003 = vmatprep.subr.bf16.mxu0 %v1614_v13 }
 0x691   :  { %1004 = vmatpush1.bf16.msra.mxu0 %v1612_v14 }
 0x692   :  { %1005 = vmatprep.subr.bf16.mxu0 %v1617_v15 }
 0x695   :  { %1006 = vmatpush1.bf16.msra.mxu0 %v1615_v16 }
 0x74b   :  { %v575_v22 = vpop.f32.mrb[8].mxu0 }
 0x74c   :  { %v576_v23 = vadd.f32 %v1326_v21, %v575_v22  ;;  %v1516_v24 = vpop.f32.mrb[9].mxu0  ;;  %v1621_v21 = vld [vmem:[#allocation11 + $0x8] sm:$0xff]   ;;  %v1622_v22 = vld [vmem:[#allocation11 + $0x50] sm:$0xff]  }
 0x74d   :  { %v578_v25 = vpop.f32.mrb[10].mxu0  ;;  %v1624_v24 = vld [vmem:[#allocation11 + $0x58] sm:$0xff]  }
 0x74e   :  { %v582_v26 = vrot.slane %v576_v23, 1  ;;  %v1517_v27 = vpop.f32.mrb[11].mxu0  ;;  %v1625_v25 = vld [vmem:[#allocation11 + $0x18] sm:$0xff]  }
 0x74f   :  { %v1627_v27 = vld [vmem:[#allocation11 + $0x20] sm:$0xff]  }
 0x750   :  { %1519 = vmatpush3.xpose.msra.mxu1 %v582_v26 }
 0x751   :  { %1523 = vmatprep.subr.mxu1 %v1832_v0 }
 0x753   :  { %1521 = vmatmul.mubr.f32.vlgmr.msra.gmra.mrb[8].mxu1 %v576_v23  ;;  %v1623_v23 = vld [vmem:[#allocation11 + $0x10] sm:$0xff]  }
 0x754   :  { %1524 = vmatpush3.msk.msra.mxu1 %vm671_vm6, %v582_v26  ;;  %1525 = vmatprep.mubr.msk.f32.mxu1 %vm1833_vm0, %v1832_v0  ;;  %v1626_v26 = vld [vmem:[#allocation11 + $0x60] sm:$0xff]  }
 0x755   :  { %1528 = vmatprep.subr.bf16.mxu1 %v1832_v0 }
 0x826   :  { %v650_v28 = vpop.f32.mrb[8].mxu1 }
 0x827   :  { %v654_v29 = vmul.f32 0.088388346, %v650_v28  ;;  %v1522_v30 = vpop.f32.mrb[9].mxu1  ;;  %v1628_v28 = vld [vmem:[#allocation11 + $0x68] sm:$0xff]  }
 0x829   :  { %v656_v31 = vsel %vm655_vm7, %v654_v29, -inf }
 0x82a   :  { %657 = vmax.xlane.f32.xlu0 %v656_v31 }
 0x8b7   :  { %v658_v32 = vpop.xlane.xlu0 %657 }
 0x8b8   :  { %v659_v33 = vsub.f32 %v654_v29, %v658_v32 }
 0x8ba   :  { %v660_v34 = vmul.f32 1.442695, %v659_v33 }
 0x8bc   :  { %1642 = vpow2.f32 %v660_v34 }
 0x8c6   :  { %v1643_v35 = vpop.eup %1642 }
 0x8c7   :  { %v662_v36 = vsel %vm655_vm7, %v1643_v35, 0.0 }
 0x8c8   :  { %663 = vadd.xlane.f32.xlu1 %v662_v36 }
 0x955   :  { %v664_v37 = vpop.xlane.xlu1 %663 }
 0x956   :  { %1644 = vrcp.f32 %v664_v37  ;;  %v875_v37 = vlaneseq }
 0x960   :  { %v1645_v38 = vpop.eup %1644 }
 0x961   :  { %v666_v40 = vmul.f32 %v1645_v38, %v1643_v35  ;;  %v876_v38 = vshrl.u32 %v875_v37, 7 }
 0x963   :  { %1526 = vmatmul.mubr.msk.f32.vlgmr.msra.gmra.mrb[10].mxu1 %vm667_vm8, %v666_v40  ;;  %v851_v40 = vld [vmem:[#allocation8 + $0x6] sm:$0x1] }
 0x964   :  { %1529 = vmatpush3.bf16.msra.mxu1 %v1586_v39  ;;  %1544 = vmatprep.mubr.msk.bf16.mxu1 %vm1833_vm0, %v1832_v0 }
 0x965   :  { %1530 = vmatprep.subr.bf16.mxu1 %v1832_v0 }
 0x968   :  { %1531 = vmatpush3.bf16.msra.mxu1 %v1587_v41 }
 0x969   :  { %1532 = vmatprep.subr.bf16.mxu1 %v1832_v0 }
 0x96c   :  { %1533 = vmatpush3.bf16.msra.mxu1 %v1588_v42  ;;  %v852_v42 = vld [vmem:[#allocation8 + $0x7] sm:$0x1] }
 0x96d   :  { %1534 = vmatprep.subr.bf16.mxu1 %v1832_v0 }
 0x970   :  { %1535 = vmatpush3.bf16.msra.mxu1 %v1589_v43 }
 0x971   :  { %1536 = vmatprep.subr.bf16.mxu1 %v1832_v0 }
 0x974   :  { %1537 = vmatpush3.bf16.msra.mxu1 %v1590_v44  ;;  %v877_v44 = vsub.s32 0, %v876_v38 }
 0x975   :  { %1538 = vmatprep.subr.bf16.mxu1 %v1832_v0 }
 0x978   :  { %1539 = vmatpush3.bf16.msra.mxu1 %v1591_v45 }
 0x979   :  { %1540 = vmatprep.subr.bf16.mxu1 %v1832_v0 }
 0x97c   :  { %1541 = vmatpush3.bf16.msra.mxu1 %v1592_v46 }
 0x97d   :  { %1542 = vmatprep.subr.bf16.mxu1 %v1832_v0 }
 0x980   :  { %1543 = vmatpush3.bf16.msra.mxu1 %v1593_v47  ;;  %v109_v47 = vld [vmem:[#allocation2 + $0x8] sm:$0xff] }
 0x981   :  { %1424 = vmatprep.subr.bf16.mxu1 %v1618_v17 }
 0xa36   :  { %v740_v48 = vpop.f32.mrb[10].mxu1 }
 0xa37   :  { %v744_v49 = vpack.c.bf16 %v740_v48, %v740_v48  ;;  %v1527_v50 = vpop.f32.mrb[11].mxu1 }
 0xa39   :  { %1545 = vmatmul.mubr.bf16.vlgmr.msra.gmra.mrb[12].mxu1 %v744_v49 }
 0xa3a   :  { %1425 = vmatpush3.bf16.msra.mxu1 %v1619_v19 }
 0xa3b   :  { %1426 = vmatprep.subr.bf16.mxu1 %v1620_v20 }
 0xa3e   :  { %1427 = vmatpush3.bf16.msra.mxu1 %v1621_v21 }
 0xa3f   :  { %1428 = vmatprep.subr.bf16.mxu1 %v1622_v22 }
 0xa42   :  { %1429 = vmatpush3.bf16.msra.mxu1 %v1623_v23 }
 0xa43   :  { %1430 = vmatprep.subr.bf16.mxu1 %v1624_v24 }
 0xa46   :  { %1431 = vmatpush3.bf16.msra.mxu1 %v1625_v25 }
 0xa47   :  { %1432 = vmatprep.subr.bf16.mxu1 %v1626_v26 }
 0xa4a   :  { %1433 = vmatpush3.bf16.msra.mxu1 %v1627_v27 }
 0xa4b   :  { %1434 = vmatprep.subr.bf16.mxu1 %v1628_v28 }
 0xb0c   :  { %v845_v52 = vpop.f32.mrb[12].mxu1 }
 0xb0d   :  { %v846_v53 = vadd.f32 %v845_v52, %v762_v51  ;;  %v1546_v54 = vpop.f32.mrb[13].mxu1  ;;  %v1629_v52 = vld [vmem:[#allocation11 + $0x28] sm:$0xff]  }
 0xb0e   :  { %v848_v55 = vpop.f32.mrb[14].mxu1  ;;  %1435 = vmatpush3.bf16.msra.mxu1 %v1629_v52  ;;  %v1631_v54 = vld [vmem:[#allocation11 + $0x30] sm:$0xff]  }
 0xb0f   :  { %v1547_v56 = vpop.f32.mrb[15].mxu1  ;;  %v853_v57 = vsel %vm468_vm5, %v846_v53, 0.0  ;;  %v1632_v55 = vld [vmem:[#allocation11 + $0x78] sm:$0xff]  }
 0xb10   :  { %854 = vadd.xlane.f32.xlu0 %v853_v57  ;;  %v1633_v56 = vld [vmem:[#allocation11 + $0x38] sm:$0xff]  }
 0xb9d   :  { %v855_v58 = vpop.xlane.xlu0 %854 }
 0xb9e   :  { %v856_v59 = vmul.f32 0.0078125, %v855_v58 }
 0xba0   :  { %v2037_v60 = vsub.f32 %v846_v53, %v856_v59  ;;  %v1630_v53 = vld [vmem:[#allocation11 + $0x70] sm:$0xff]  }
 0xba1   :  { %1436 = vmatprep.subr.bf16.mxu1 %v1630_v53 }
 0xba2   :  { %v858_v0 = vmul.f32 %v2037_v60, %v2037_v60  ;;  %1437 = vmatpush3.bf16.msra.mxu1 %v1631_v54 }
 0xba3   :  { %1438 = vmatprep.subr.bf16.mxu1 %v1632_v55 }
 0xba4   :  { %v859_v61 = vsel %vm468_vm5, %v858_v0, 0.0 }
 0xba5   :  { %860 = vadd.xlane.f32.xlu1 %v859_v61 }
 0xba6   :  { %1439 = vmatpush3.bf16.msra.mxu1 %v1633_v56 }
 0xc32   :  { %v861_v29 = vpop.xlane.xlu1 %860 }
 0xc33   :  { %v862_v30 = vmul.f32 0.007874016, %v861_v29 }
 0xc35   :  { %1646 = vrsqrt.f32 %v862_v30  ;;  %vm865_vm9 = vcmp.eq.f32.partialorder %v862_v30, inf  ;;  %v868_v33 = vand.u32 2147483648, %v862_v30  ;;  %vm867_vm10 = vcmp.eq.f32.partialorder %v862_v30, 0.0 }
 0xc3f   :  { %v1647_v31 = vpop.eup %1646 }
 0xc40   :  { %v864_v32 = vmul.f32 %v1647_v31, %v862_v30 }
 0xc42   :  { %v866_v34 = vsel %vm865_vm9, %v862_v30, %v864_v32 }
 0xc43   :  { %v869_v35 = vsel %vm867_vm10, %v868_v33, %v866_v34 }
 0xc44   :  { %v870_v36 = vadd.f32 1e-05, %v869_v35 }
 0xc46   :  { %1648 = vrcp.f32 %v870_v36 }
 0xc50   :  { %v1649_v39 = vpop.eup %1648 }
 0xc51   :  { %v872_v41 = vmul.f32 %v1649_v39, %v2037_v60 }
 0xc53   :  { %v873_v43 = vmul.f32 %v872_v41, %v851_v40 }
 0xc55   :  { %v874_v45 = vadd.f32 %v873_v43, %v852_v42 }
 0xc57   :  { %v878_v46 = vrot.slane %v874_v45, %v877_v44 }
 0xc59   :  { %v879_v48 = vadd.f32 %v878_v46, %v2019_v18  ;;  %v907_v18 = vsub.s32 1, %v876_v38 }
 0xc5b   :  { %v2045_v49 = vadd.f32 %v879_v48, %v1985_v9  ;;  %v2047_v50 = vadd.f32 %v879_v48, %v109_v47  ;;  %v899_v9 = vld [vmem:[%s2076_s5] sm:$0x3]  ;;  %s1835_s5 = smov [#allocation13]  }
 0xc5c   :  { %v904_v57 = vrot.slane %v899_v9, %v877_v44  ;;  %v908_v58 = vrot.slane %v899_v9, %v907_v18  ;;  %s1290_s19 = sshll.u32 %s1835_s5, 4  ;;  %s1291_s19 = int_to_ptr.vmem [resolvable:$true] %s1290_s19 }
 0xc5d   :  { %v882_v51 = vpack.c.bf16 %v2047_v50, %v2045_v49  ;;  %s1790_s8 = scalar_lea.vmem %s1291_s19, 256  ;;  %p1795_p9 = scmp.lt.s32.totalorder %s1291_s19, %s1291_s19 }
 0xc5e   :  { %p1791_p8 = scmp.ne.s32.totalorder %s1291_s19, %s1790_s8  ;;  %p1796_p10 = scmp.lt.s32.totalorder %s1790_s8, %s1790_s8 }
 0xc5f   :  { %1024 = vmatmul.mubr.bf16.vlgmr.msra.gmra.mrb[12].mxu0 %v882_v51 }
 0xc60   :  { %p1797_p11 = por %p1796_p10, %p1795_p9 }
 0xc62   :  { %p1798_p12 = pnand %p1797_p11, %p1791_p8 }
 0xd32   :  { %v1025_v59 = vpop.f32.mrb[12].mxu0 }
 0xd33   :  { %v1026_v60 = vadd.f32 %v1025_v59, %v904_v57  ;;  %v1027_v0 = vpop.f32.mrb[13].mxu0 }
 0xd34   :  { %v1028_v61 = vadd.f32 %v1027_v0, %v908_v58  ;;  %v1029_v62 = vpop.f32.mrb[14].mxu0 }
 0xd35   :  { %v1030_v63 = vadd.f32 %v1029_v62, %v904_v57  ;;  %v1031_v1 = vpop.f32.mrb[15].mxu0  ;;  %v1034_v3 = vmax.f32 %v1026_v60, 0.0  ;;  %v1378_v60 = vld [vmem:[#allocation8 + $0x9] ss:$0 sm:$0xff]  ;;  %v1379_v62 = vld [vmem:[#allocation8 + $0xa] ss:$0 sm:$0xff] }
 0xd36   :  { %v1032_v2 = vadd.f32 %v1031_v1, %v908_v58  ;;  %v1035_v5 = vmax.f32 %v1028_v61, 0.0 }
 0xd37   :  { %v1036_v4 = vmax.f32 %v1030_v63, 0.0 }
 0xd38   :  { %v1037_v6 = vmax.f32 %v1032_v2, 0.0 }
 0xd39   :  { %v1038_v7 = vpack.c.bf16 %v1036_v4, %v1034_v3 }
 0xd3a   :  { %v1039_v8 = vpack.c.bf16 %v1037_v6, %v1035_v5 }
 0xd3c   :  { %1205 = vmatprep.mubr.bf16.mxu1 %v1039_v8 }
 0xd3d   :  { %1206 = vmatmul.mubr.bf16.vlgmr.msra.gmra.mrb[16].mxu1 %v1038_v7 }
 0xe10   :  { %v1440_v10 = vpop.f32.mrb[16].mxu1 }
 0xe11   :  { %v1441_v12 = vpop.f32.mrb[17].mxu1 }
 0xe12   :  { %v1442_v13 = vadd.f32 %v1441_v12, %v1440_v10  ;;  %v1443_v14 = vpop.f32.mrb[18].mxu1 }
 0xe13   :  { %v1444_v15 = vpop.f32.mrb[19].mxu1 }
 0xe14   :  { %v1208_v16 = vadd.f32 %v1442_v13, %v1361_v11  ;;  %v1445_v17 = vadd.f32 %v1444_v15, %v1443_v14 }
 0xe16   :  { %v1211_v19 = vadd.f32 %v1445_v17, %v1361_v11  ;;  %1229 = vadd.xlane.f32.xlu0 %v1208_v16  ;;  %v1214_v29 = vrot.slane %v1208_v16, 4 }
 0xe18   :  { %1231 = vadd.xlane.f32.xlu1 %v1211_v19  ;;  %v1220_v32 = vrot.slane %v1211_v19, 4  ;;  %v1215_v34 = vadd.f32 %v1214_v29, %v1208_v16 }
 0xe1a   :  { %v1221_v35 = vadd.f32 %v1220_v32, %v1211_v19  ;;  %v1216_v36 = vrot.slane %v1215_v34, 2 }
 0xe1c   :  { %v1222_v37 = vrot.slane %v1221_v35, 2  ;;  %v1217_v39 = vadd.f32 %v1216_v36, %v1215_v34 }
 0xe1e   :  { %v1223_v43 = vadd.f32 %v1222_v37, %v1221_v35  ;;  %v1218_v47 = vrot.slane %v1217_v39, 1 }
 0xe20   :  { %v1224_v54 = vrot.slane %v1223_v43, 1  ;;  %v1219_v56 = vadd.f32 %v1218_v47, %v1217_v39 }
 0xe22   :  { %v1225_v9 = vadd.f32 %v1224_v54, %v1223_v43  ;;  %v1227_v18 = vmul.f32 0.125, %v1219_v56 }
 0xe24   :  { %v1228_v57 = vmul.f32 0.125, %v1225_v9  ;;  %v1246_v58 = vsub.f32 %v1208_v16, %v1227_v18 }
 0xe26   :  { %v1247_v61 = vsub.f32 %v1211_v19, %v1228_v57 }
 0xea3   :  { %v1230_v20 = vpop.xlane.xlu0 %1229 }
 0xea4   :  { %v1233_v21 = vmul.f32 0.0078125, %v1230_v20 }
 0xea5   :  { %v1232_v22 = vpop.xlane.xlu1 %1231 }
 0xea6   :  { %v1234_v23 = vmul.f32 0.0078125, %v1232_v22  ;;  %v1235_v24 = vsub.f32 %v1208_v16, %v1233_v21 }
 0xea8   :  { %v1237_v25 = vmul.f32 %v1235_v24, %v1235_v24  ;;  %v1236_v26 = vsub.f32 %v1211_v19, %v1234_v23 }
 0xeaa   :  { %1239 = vadd.xlane.f32.xlu0 %v1237_v25  ;;  %v1238_v27 = vmul.f32 %v1236_v26, %v1236_v26 }
 0xeac   :  { %1241 = vadd.xlane.f32.xlu1 %v1238_v27 }
 0xf37   :  { %v1240_v28 = vpop.xlane.xlu0 %1239 }
 0xf38   :  { %v1243_v30 = vmul.f32 0.007874016, %v1240_v28 }
 0xf39   :  { %v1242_v31 = vpop.xlane.xlu1 %1241 }
 0xf3a   :  { %1650 = vrsqrt.f32 %v1243_v30  ;;  %v1244_v33 = vmul.f32 0.007874016, %v1242_v31  ;;  %vm1250_vm11 = vcmp.eq.f32.partialorder %v1243_v30, inf  ;;  %v1253_v41 = vand.u32 2147483648, %v1243_v30 }
 0xf3b   :  { %vm1252_vm12 = vcmp.eq.f32.partialorder %v1243_v30, 0.0 }
 0xf3c   :  { %1652 = vrsqrt.f32 %v1244_v33  ;;  %vm1257_vm13 = vcmp.eq.f32.partialorder %v1244_v33, inf  ;;  %v1260_v51 = vand.u32 2147483648, %v1244_v33  ;;  %vm1259_vm14 = vcmp.eq.f32.partialorder %v1244_v33, 0.0 }
 0xf44   :  { %v1651_v38 = vpop.eup %1650 }
 0xf45   :  { %v1249_v40 = vmul.f32 %v1651_v38, %v1243_v30 }
 0xf46   :  { %v1653_v42 = vpop.eup %1652 }
 0xf47   :  { %v1251_v44 = vsel %vm1250_vm11, %v1243_v30, %v1249_v40  ;;  %v1256_v46 = vmul.f32 %v1653_v42, %v1244_v33 }
 0xf48   :  { %v1254_v45 = vsel %vm1252_vm12, %v1253_v41, %v1251_v44 }
 0xf49   :  { %v1262_v48 = vadd.f32 1e-05, %v1254_v45  ;;  %v1258_v52 = vsel %vm1257_vm13, %v1244_v33, %v1256_v46 }
 0xf4a   :  { %v1261_v53 = vsel %vm1259_vm14, %v1260_v51, %v1258_v52 }
 0xf4b   :  { %1654 = vrcp.f32 %v1262_v48  ;;  %v1263_v55 = vadd.f32 1e-05, %v1261_v53 }
 0xf4d   :  { %1656 = vrcp.f32 %v1263_v55 }
 0xf55   :  { %v1655_v59 = vpop.eup %1654 }
 0xf56   :  { %v1265_v0 = vmul.f32 %v1655_v59, %v1246_v58 }
 0xf57   :  { %v1657_v63 = vpop.eup %1656 }
 0xf58   :  { %v1272_v1 = vmul.f32 %v1378_v60, %v1265_v0  ;;  %v1267_v2 = vmul.f32 %v1657_v63, %v1247_v61 }
 0xf5a   :  { %v1279_v3 = vadd.f32 %v1379_v62, %v1272_v1  ;;  %v1273_v4 = vmul.f32 %v1378_v60, %v1267_v2 }
 0xf5c   :  { %v1281_v5 = vadd.f32 %v1279_v3, %v2045_v49  ;;  %v1280_v6 = vadd.f32 %v1379_v62, %v1273_v4 }
 0xf5e   :  { %1283 = vst [vmem:[#allocation13] sm:$0xff] %v1281_v5  ;;  %v1282_v7 = vadd.f32 %v1280_v6, %v2047_v50 }
 0xf60   :  { %1284 = vst [vmem:[#allocation13 + $0x8] sm:$0xff] %v1282_v7 }
 0xf61   :  { %1801 = shalt.err (!%p1798_p12)
}
 0xf62   :  { %s1802_s11 = scalar_lea.hbm %s2078_s7, 256 }
 0xf63   :  { %p1803_p13 = scmp.ne.s32.totalorder %s2078_s7, %s1802_s11  ;;  %p1806_p0 = scmp.lt.u32.totalorder %s1802_s11, %s2078_s7 }
 0xf65   :  { %p1808_p1 = pnand %p1806_p0, %p1803_p13 }
 0xf67   :  { %1811 = shalt.err (!%p1808_p1)
}
 0xf68   :  { %1296 = dma.vmem_to_hbm [thread:$0]  %s1291_s19, 256, %s2078_s7, [#allocation4], %s1825_s25, %s1825_s25, %s1826_s28  }
 0xf69   :  { %1820 = dma.done.wait [#allocation4], 256  }
 0xf6a   :  { %1821 = vsyncadd [#allocation4], 4294967040 }
 0xf6b   :  { %1300 = vsyncpa [#allocation3], 1 }
 0xf6c   :  { %1301 = vsyncpa [#allocation6], 1 }
 0xf6d   :  { %1302 = vsyncpa [#allocation9], 1 }
 0xf6e   :  { %1303 = vsyncpa [#allocation12], 1 }
 0xf6f   :  { %1304 = vsyncpa [#allocation4], 1 }

</bundles_post_ra>
